<compile_context>
chip_gen: v7x
topology: tpu7x:2x2x1
jax: 0.10.0
libtpu: 0.0.40
codegen_flags: <defaults>
</compile_context>

<pallas_src>
import jax
import jax.numpy as jnp
from jax.experimental import pallas as pl
from jax.experimental.pallas import tpu as pltpu

HIDDEN_SIZE = [128, 64]
INPUT_SIZE = 784
OUTPUT_SIZE = 10

H1 = HIDDEN_SIZE[0]      # 128, already a full lane width
H2_PAD = 128             # hidden2 (64) zero-padded to a full vreg lane width
OUT_PAD = 128            # output (10) padded to a full vreg lane width
NEG_INF = -1e30          # bias value for padded logit lanes (drops out of softmax)

MAX_BATCH_TILE = 2048    # double-buffered bf16 x tile ~6.3 MiB: fits v5e/v6e/v7x VMEM


def _round_up(n, m):
    return ((n + m - 1) // m) * m


def mlp_kernel(x_ref, w1_ref, b1_ref, w2_ref, b2_ref, w3_ref, b3_ref, o_ref):
    # layer1: bf16 x @ bf16 W1 on the MXU, f32 accumulation; bias + ReLU in f32.
    h1 = jnp.dot(x_ref[...], w1_ref[...], preferred_element_type=jnp.float32)
    h1 = jnp.maximum(h1 + b1_ref[...], 0.0)

    # layer2 (64 -> padded to 128 lanes; padded columns stay exactly 0) + ReLU.
    h2 = jnp.dot(h1.astype(jnp.bfloat16), w2_ref[...],
                 preferred_element_type=jnp.float32)
    h2 = jnp.maximum(h2 + b2_ref[...], 0.0)

    # layer3 (10 -> padded to 128 lanes; padded lanes get bias = -1e30) + LogSoftmax.
    logits = jnp.dot(h2.astype(jnp.bfloat16), w3_ref[...],
                     preferred_element_type=jnp.float32) + b3_ref[...]
    m = jnp.max(logits, axis=-1, keepdims=True)
    shifted = logits - m
    lse = jnp.log(jnp.sum(jnp.exp(shifted), axis=-1, keepdims=True))
    o_ref[...] = (shifted - lse).astype(o_ref.dtype)


def _prepare_params(params):
    """One-time cast/pad: bf16 matmul weights, 128-lane padding of layers 2/3."""
    w1, b1, w2, b2, w3, b3 = params
    w1p = w1.astype(jnp.bfloat16)                                      # (784, 128)
    b1p = b1.astype(jnp.float32)                                       # (1, 128)
    w2p = jnp.pad(w2, ((0, 0), (0, H2_PAD - w2.shape[1]))
                  ).astype(jnp.bfloat16)                               # (128, 128)
    b2p = jnp.pad(b2, ((0, 0), (0, H2_PAD - b2.shape[1]))
                  ).astype(jnp.float32)                                # (1, 128)
    w3p = jnp.pad(w3, ((0, H2_PAD - w3.shape[0]),
                       (0, OUT_PAD - w3.shape[1]))).astype(jnp.bfloat16)  # (128, 128)
    b3p = jnp.pad(b3, ((0, 0), (0, OUT_PAD - b3.shape[1])),
                  constant_values=NEG_INF).astype(jnp.float32)         # (1, 128)
    return w1p, b1p, w2p, b2p, w3p, b3p


def neural_net_forward(x, params, *, batch_tile=None):
    B = x.shape[0]
    w1p, b1p, w2p, b2p, w3p, b3p = _prepare_params(params)

    tb = MAX_BATCH_TILE if batch_tile is None else batch_tile
    tb = min(tb, _round_up(B, 8))          # sublane-aligned tile, never bigger than needed
    b_pad = _round_up(B, tb)
    grid = (b_pad // tb,)

    x_p = x if b_pad == B else jnp.pad(x, ((0, b_pad - B), (0, 0)))
    x_p = x_p.astype(jnp.bfloat16)         # halve HBM traffic of the dominant stream

    const = lambda i: (0, 0)               # grid-invariant: weights stay resident in VMEM
    out_padded = pl.pallas_call(
        mlp_kernel,
        out_shape=jax.ShapeDtypeStruct((b_pad, OUT_PAD), jnp.float32),
        grid=grid,
        in_specs=[
            pl.BlockSpec((tb, INPUT_SIZE), lambda i: (i, 0)),   # x: streamed per batch tile
            pl.BlockSpec((INPUT_SIZE, H1), const),              # W1
            pl.BlockSpec((1, H1), const),                       # b1
            pl.BlockSpec((H1, H2_PAD), const),                  # W2 (lane-padded)
            pl.BlockSpec((1, H2_PAD), const),                   # b2 (lane-padded)
            pl.BlockSpec((H2_PAD, OUT_PAD), const),             # W3 (lane-padded)
            pl.BlockSpec((1, OUT_PAD), const),                  # b3 (lane-padded, -inf pad)
        ],
        out_specs=pl.BlockSpec((tb, OUT_PAD), lambda i: (i, 0)),
        compiler_params=pltpu.CompilerParams(
            dimension_semantics=("parallel",),      # megacore sharding on v7x
            vmem_limit_bytes=48 * 1024 * 1024,      # headroom below v7x's 64 MiB
        ),
    )(x_p, w1p, b1p, w2p, b2p, w3p, b3p)

    # Strip batch padding and the 118 padded logit lanes (lane-dense store in-kernel).
    return out_padded[:B, :OUTPUT_SIZE]


def init_params(key):
    """Deterministic init matching torch.nn.Linear default: U(-1/sqrt(fan_in), ...)."""
    def linear(k, fan_in, fan_out):
        kw, kb = jax.random.split(k)
        bound = 1.0 / jnp.sqrt(fan_in)
        # stored as (in, out): torch's (out, in) weight, pre-transposed
        w = jax.random.uniform(kw, (fan_in, fan_out), jnp.float32, -bound, bound)
        b = jax.random.uniform(kb, (1, fan_out), jnp.float32, -bound, bound)
        return w, b

    k1, k2, k3 = jax.random.split(key, 3)
    w1, b1 = linear(k1, INPUT_SIZE, HIDDEN_SIZE[0])
    w2, b2 = linear(k2, HIDDEN_SIZE[0], HIDDEN_SIZE[1])
    w3, b3 = linear(k3, HIDDEN_SIZE[1], OUTPUT_SIZE)
    return (w1, b1, w2, b2, w3, b3)


def reference_forward(x, params):
    """Same module semantics with the same bf16 matmul-operand choices as the kernel."""
    w1, b1, w2, b2, w3, b3 = params
    h1 = jnp.dot(x.astype(jnp.bfloat16), w1.astype(jnp.bfloat16),
                 preferred_element_type=jnp.float32) + b1
    h1 = jnp.maximum(h1, 0.0)
    h2 = jnp.dot(h1.astype(jnp.bfloat16), w2.astype(jnp.bfloat16),
                 preferred_element_type=jnp.float32) + b2
    h2 = jnp.maximum(h2, 0.0)
    logits = jnp.dot(h2.astype(jnp.bfloat16), w3.astype(jnp.bfloat16),
                     preferred_element_type=jnp.float32) + b3
    return jax.nn.log_softmax(logits, axis=1)


if __name__ == "__main__":
    key = jax.random.PRNGKey(0)
    k_params, k_x = jax.random.split(key)

    params = init_params(k_params)

    # small single-tile case
    batch = 8
    x = jax.random.normal(k_x, (batch, INPUT_SIZE), jnp.float32)
    out = jax.block_until_ready(neural_net_forward(x, params))
    ref = jax.block_until_ready(reference_forward(x, params))
    assert out.shape == (batch, OUTPUT_SIZE)
    assert jnp.allclose(out, ref, atol=2e-3, rtol=2e-3), float(jnp.max(jnp.abs(out - ref)))

    # multi-tile grid + non-divisible batch (exercises batch padding / pipelining)
    batch2 = 20
    x2 = jax.random.normal(jax.random.PRNGKey(1), (batch2, INPUT_SIZE), jnp.float32)
    out2 = jax.block_until_ready(neural_net_forward(x2, params, batch_tile=8))
    ref2 = jax.block_until_ready(reference_forward(x2, params))
    assert out2.shape == (batch2, OUTPUT_SIZE)
    assert jnp.allclose(out2, ref2, atol=2e-3, rtol=2e-3), float(jnp.max(jnp.abs(out2 - ref2)))

    print("KERNEL_OK")
</pallas_src>

<mosaic_0001>
module attributes {stable_mosaic.version = 11 : i64} {
  func.func @mlp_kernel(%arg0: i32, %arg1: memref<8x784xbf16, #tpu.memory_space<vmem>>, %arg2: memref<784x128xbf16, #tpu.memory_space<vmem>>, %arg3: memref<1x128xf32, #tpu.memory_space<vmem>>, %arg4: memref<128x128xbf16, #tpu.memory_space<vmem>>, %arg5: memref<1x128xf32, #tpu.memory_space<vmem>>, %arg6: memref<128x128xbf16, #tpu.memory_space<vmem>>, %arg7: memref<1x128xf32, #tpu.memory_space<vmem>>, %arg8: memref<8x128xf32, #tpu.memory_space<vmem>>) attributes {dimension_semantics = [#tpu.dimension_semantics<parallel>], iteration_bounds = array<i64: 1>, scalar_prefetch = 0 : i64, scratch_operands = 0 : i64, tpu.core_type = #tpu.core_type<tc>, window_params = [{transform_indices = @transform_0, window_bounds = array<i64: 8, 784>}, {pipeline_mode = #tpu.pipeline_mode<synchronous>, transform_indices = @transform_1, window_bounds = array<i64: 784, 128>}, {pipeline_mode = #tpu.pipeline_mode<synchronous>, transform_indices = @transform_2, window_bounds = array<i64: 1, 128>}, {pipeline_mode = #tpu.pipeline_mode<synchronous>, transform_indices = @transform_3, window_bounds = array<i64: 128, 128>}, {pipeline_mode = #tpu.pipeline_mode<synchronous>, transform_indices = @transform_4, window_bounds = array<i64: 1, 128>}, {pipeline_mode = #tpu.pipeline_mode<synchronous>, transform_indices = @transform_5, window_bounds = array<i64: 128, 128>}, {pipeline_mode = #tpu.pipeline_mode<synchronous>, transform_indices = @transform_6, window_bounds = array<i64: 1, 128>}, {transform_indices = @transform_7, window_bounds = array<i64: 8, 128>}]} {
    %c0 = arith.constant 0 : index
    %c0_0 = arith.constant 0 : index
    %0 = vector.load %arg1[%c0, %c0_0] : memref<8x784xbf16, #tpu.memory_space<vmem>>, vector<8x784xbf16>
    %c0_1 = arith.constant 0 : index
    %c0_2 = arith.constant 0 : index
    %1 = vector.load %arg2[%c0_1, %c0_2] : memref<784x128xbf16, #tpu.memory_space<vmem>>, vector<784x128xbf16>
    %cst = arith.constant dense<0.000000e+00> : vector<8x128xf32>
    %2 = tpu.matmul %0, %1, %cst {dimension_numbers = #tpu.dot_dimension_numbers<[1], [0], [0], [1], [0, 0, 1, 1], [], []>} : vector<8x784xbf16>, vector<784x128xbf16>, vector<8x128xf32> -> vector<8x128xf32>
    %c0_3 = arith.constant 0 : index
    %c0_4 = arith.constant 0 : index
    %3 = vector.load %arg3[%c0_3, %c0_4] : memref<1x128xf32, #tpu.memory_space<vmem>>, vector<1x128xf32>
    %4 = vector.broadcast %3 : vector<1x128xf32> to vector<8x128xf32>
    %5 = arith.addf %2, %4 : vector<8x128xf32>
    %cst_5 = arith.constant 0.000000e+00 : f32
    %6 = vector.broadcast %cst_5 : f32 to vector<8x128xf32>
    %7 = arith.maximumf %5, %6 : vector<8x128xf32>
    %8 = arith.truncf %7 : vector<8x128xf32> to vector<8x128xbf16>
    %c0_6 = arith.constant 0 : index
    %c0_7 = arith.constant 0 : index
    %9 = vector.load %arg4[%c0_6, %c0_7] : memref<128x128xbf16, #tpu.memory_space<vmem>>, vector<128x128xbf16>
    %cst_8 = arith.constant dense<0.000000e+00> : vector<8x128xf32>
    %10 = tpu.matmul %8, %9, %cst_8 {dimension_numbers = #tpu.dot_dimension_numbers<[1], [0], [0], [1], [0, 0, 1, 1], [], []>} : vector<8x128xbf16>, vector<128x128xbf16>, vector<8x128xf32> -> vector<8x128xf32>
    %c0_9 = arith.constant 0 : index
    %c0_10 = arith.constant 0 : index
    %11 = vector.load %arg5[%c0_9, %c0_10] : memref<1x128xf32, #tpu.memory_space<vmem>>, vector<1x128xf32>
    %12 = vector.broadcast %11 : vector<1x128xf32> to vector<8x128xf32>
    %13 = arith.addf %10, %12 : vector<8x128xf32>
    %cst_11 = arith.constant 0.000000e+00 : f32
    %14 = vector.broadcast %cst_11 : f32 to vector<8x128xf32>
    %15 = arith.maximumf %13, %14 : vector<8x128xf32>
    %16 = arith.truncf %15 : vector<8x128xf32> to vector<8x128xbf16>
    %c0_12 = arith.constant 0 : index
    %c0_13 = arith.constant 0 : index
    %17 = vector.load %arg6[%c0_12, %c0_13] : memref<128x128xbf16, #tpu.memory_space<vmem>>, vector<128x128xbf16>
    %cst_14 = arith.constant dense<0.000000e+00> : vector<8x128xf32>
    %18 = tpu.matmul %16, %17, %cst_14 {dimension_numbers = #tpu.dot_dimension_numbers<[1], [0], [0], [1], [0, 0, 1, 1], [], []>} : vector<8x128xbf16>, vector<128x128xbf16>, vector<8x128xf32> -> vector<8x128xf32>
    %c0_15 = arith.constant 0 : index
    %c0_16 = arith.constant 0 : index
    %19 = vector.load %arg7[%c0_15, %c0_16] : memref<1x128xf32, #tpu.memory_space<vmem>>, vector<1x128xf32>
    %20 = vector.broadcast %19 : vector<1x128xf32> to vector<8x128xf32>
    %21 = arith.addf %18, %20 : vector<8x128xf32>
    %cst_17 = arith.constant dense<0xFF800000> : vector<8xf32>
    %22 = vector.multi_reduction <maximumf>, %21, %cst_17 [1] : vector<8x128xf32> to vector<8xf32>
    %23 = vector.shape_cast %22 : vector<8xf32> to vector<8x1xf32>
    %24 = vector.broadcast %23 : vector<8x1xf32> to vector<8x128xf32>
    %25 = arith.subf %21, %24 : vector<8x128xf32>
    %26 = math.exp %25 : vector<8x128xf32>
    %cst_18 = arith.constant dense<0.000000e+00> : vector<8xf32>
    %27 = vector.multi_reduction <add>, %26, %cst_18 [1] : vector<8x128xf32> to vector<8xf32>
    %28 = vector.shape_cast %27 : vector<8xf32> to vector<8x1xf32>
    %29 = math.log %28 : vector<8x1xf32>
    %30 = vector.broadcast %29 : vector<8x1xf32> to vector<8x128xf32>
    %31 = arith.subf %25, %30 : vector<8x128xf32>
    %c0_19 = arith.constant 0 : index
    %c0_20 = arith.constant 0 : index
    %32 = vector.load %arg8[%c0_19, %c0_20] : memref<8x128xf32, #tpu.memory_space<vmem>>, vector<8x128xf32>
    tpu.vector_store %arg8[%c0_19, %c0_20], %31 {strides = array<i32>} : memref<8x128xf32, #tpu.memory_space<vmem>>, vector<8x128xf32>,
    return
  }
  func.func @transform_0(%arg0: i32) -> (i32, i32) {
    %c0_i32 = arith.constant 0 : i32
    %c0_i32_0 = arith.constant 0 : i32
    return %arg0, %c0_i32 : i32, i32
  }
  func.func @transform_1(%arg0: i32) -> (i32, i32) {
    %c0_i32 = arith.constant 0 : i32
    %c0_i32_0 = arith.constant 0 : i32
    %c0_i32_1 = arith.constant 0 : i32
    return %c0_i32, %c0_i32_0 : i32, i32
  }
  func.func @transform_2(%arg0: i32) -> (i32, i32) {
    %c0_i32 = arith.constant 0 : i32
    %c0_i32_0 = arith.constant 0 : i32
    %c0_i32_1 = arith.constant 0 : i32
    return %c0_i32, %c0_i32_0 : i32, i32
  }
  func.func @transform_3(%arg0: i32) -> (i32, i32) {
    %c0_i32 = arith.constant 0 : i32
    %c0_i32_0 = arith.constant 0 : i32
    %c0_i32_1 = arith.constant 0 : i32
    return %c0_i32, %c0_i32_0 : i32, i32
  }
  func.func @transform_4(%arg0: i32) -> (i32, i32) {
    %c0_i32 = arith.constant 0 : i32
    %c0_i32_0 = arith.constant 0 : i32
    %c0_i32_1 = arith.constant 0 : i32
    return %c0_i32, %c0_i32_0 : i32, i32
  }
  func.func @transform_5(%arg0: i32) -> (i32, i32) {
    %c0_i32 = arith.constant 0 : i32
    %c0_i32_0 = arith.constant 0 : i32
    %c0_i32_1 = arith.constant 0 : i32
    return %c0_i32, %c0_i32_0 : i32, i32
  }
  func.func @transform_6(%arg0: i32) -> (i32, i32) {
    %c0_i32 = arith.constant 0 : i32
    %c0_i32_0 = arith.constant 0 : i32
    %c0_i32_1 = arith.constant 0 : i32
    return %c0_i32, %c0_i32_0 : i32, i32
  }
  func.func @transform_7(%arg0: i32) -> (i32, i32) {
    %c0_i32 = arith.constant 0 : i32
    %c0_i32_0 = arith.constant 0 : i32
    return %arg0, %c0_i32 : i32, i32
  }
}

</mosaic_0001>

<bundles_post_ra>
// kernel: tpu_custom_call.1
= control target key start
LH: loop header
LB: loop body
LE: loop exit
PB: predicated region body
PF: predicated region fallthrough
CT: control target
= control target key end

     0   :  { %12 = vsyncpa [#allocation3], 0  ;;  %s1487_s0 = inlined_call_operand.hbm [shape: bf16[8,784], index: 0, kind: input, shape index: {}]   ;;  %s1488_s1 = inlined_call_operand.hbm [shape: bf16[784,128], index: 1, kind: input, shape index: {}]   ;;  %s1489_s2 = inlined_call_operand.vmem [shape: f32[1,128], index: 2, kind: input, shape index: {}]   ;;  %s1490_s3 = inlined_call_operand.hbm [shape: bf16[128,128], index: 3, kind: input, shape index: {}]   ;;  %s1491_s4 = inlined_call_operand.vmem [shape: f32[1,128], index: 4, kind: input, shape index: {}]   ;;  %s1492_s5 = inlined_call_operand.hbm [shape: bf16[128,128], index: 5, kind: input, shape index: {}]   ;;  %s1493_s6 = inlined_call_operand.vmem [shape: f32[1,128], index: 6, kind: input, shape index: {}]   ;;  %s1494_s7 = inlined_call_operand.hbm [shape: f32[8,128], index: 7, kind: output, shape index: {}]  }
   0x1   :  { %13 = vsyncpa [#allocation6], 0 }
   0x2   :  { %14 = vsyncpa [#allocation9], 0 }
   0x3   :  { %15 = vsyncpa [#allocation4], 0  ;;  %s1337_s24 = smov [#allocation5]   ;;  %s1219_s28 = scalar_lea.hbm %s1488_s1, 6272 }
   0x4   :  { %s31_s25 = sshll.u32 %s1337_s24, 4  ;;  %p1220_p0 = scmp.ne.s32.totalorder %s1488_s1, %s1219_s28  ;;  %s32_s25 = int_to_ptr.vmem [resolvable:$true] %s31_s25 }
   0x5   :  { %p1223_p1 = scmp.lt.u32.totalorder %s1219_s28, %s1488_s1 }
   0x7   :  { %p1225_p2 = pnand %p1223_p1, %p1220_p0 }
   0x9   :  { %1228 = shalt.err (!%p1225_p2)
}
   0xa   :  { %s1229_s10 = scalar_lea.vmem %s32_s25, 6272  ;;  %p1234_p4 = scmp.lt.s32.totalorder %s32_s25, %s32_s25 }
   0xb   :  { %p1230_p3 = scmp.ne.s32.totalorder %s32_s25, %s1229_s10  ;;  %p1235_p5 = scmp.lt.s32.totalorder %s1229_s10, %s1229_s10 }
   0xd   :  { %p1236_p6 = por %p1235_p5, %p1234_p4 }
   0xf   :  { %p1237_p7 = pnand %p1236_p6, %p1230_p3 }
  0x11   :  { %1240 = shalt.err (!%p1237_p7)
}
  0x12   :  { %s1338_s11 = smov 64   ;;  %s1339_s12 = smov 4  }
  0x13   :  { %37 = dma.hbm_to_vmem [thread:$0]  %s1488_s1, 6272, %s32_s25, [#allocation6], %s1338_s11, %s1338_s11, %s1339_s12  }
  0x14   :  { %s1340_s15 = smov [#allocation2]   ;;  %s1341_s17 = smov [#allocation7]  }
  0x15   :  { %s22_s16 = sshll.u32 %s1340_s15, 4  ;;  %s45_s18 = sshll.u32 %s1341_s17, 4  ;;  %s23_s16 = int_to_ptr.vmem [resolvable:$true] %s22_s16  ;;  %s46_s18 = int_to_ptr.vmem [resolvable:$true] %s45_s18 }
  0x16   :  { %s1241_s21 = scalar_lea.hbm %s1487_s0, 448 }
  0x17   :  { %p1242_p8 = scmp.ne.s32.totalorder %s1487_s0, %s1241_s21  ;;  %p1245_p9 = scmp.lt.u32.totalorder %s1241_s21, %s1487_s0 }
  0x19   :  { %p1247_p10 = pnand %p1245_p9, %p1242_p8 }
  0x1b   :  { %1250 = shalt.err (!%p1247_p10)
}
  0x1c   :  { %s1251_s1 = scalar_lea.vmem %s23_s16, 448  ;;  %p1256_p12 = scmp.lt.s32.totalorder %s23_s16, %s23_s16 }
  0x1d   :  { %p1252_p11 = scmp.ne.s32.totalorder %s23_s16, %s1251_s1  ;;  %p1257_p13 = scmp.lt.s32.totalorder %s1251_s1, %s1251_s1 }
  0x1f   :  { %p1258_p0 = por %p1257_p13, %p1256_p12 }
  0x21   :  { %p1259_p1 = pnand %p1258_p0, %p1252_p11 }
  0x23   :  { %1262 = shalt.err (!%p1259_p1)
}
  0x24   :  { %25 = dma.hbm_to_vmem [thread:$0]  %s1487_s0, 448, %s23_s16, [#allocation3]  }
  0x25   :  { %s1263_s30 = scalar_lea.hbm %s1490_s3, 1024 }
  0x26   :  { %p1264_p2 = scmp.ne.s32.totalorder %s1490_s3, %s1263_s30  ;;  %p1267_p3 = scmp.lt.u32.totalorder %s1263_s30, %s1490_s3 }
  0x28   :  { %p1269_p4 = pnand %p1267_p3, %p1264_p2 }
  0x2a   :  { %1272 = shalt.err (!%p1269_p4)
}
  0x2b   :  { %s1273_s14 = scalar_lea.vmem %s46_s18, 1024  ;;  %p1278_p6 = scmp.lt.s32.totalorder %s46_s18, %s46_s18 }
  0x2c   :  { %p1274_p5 = scmp.ne.s32.totalorder %s46_s18, %s1273_s14  ;;  %p1279_p7 = scmp.lt.s32.totalorder %s1273_s14, %s1273_s14 }
  0x2e   :  { %p1280_p8 = por %p1279_p7, %p1278_p6 }
  0x30   :  { %p1281_p9 = pnand %p1280_p8, %p1274_p5 }
  0x32   :  { %1284 = shalt.err (!%p1281_p9)
}
  0x33   :  { %51 = dma.hbm_to_vmem [thread:$0]  %s1490_s3, 1024, %s46_s18, [#allocation6], %s1338_s11, %s1338_s11, %s1339_s12  }
  0x34   :  { %s1342_s16 = smov [#allocation8]   ;;  %s1285_s21 = scalar_lea.hbm %s1492_s5, 1024 }
  0x35   :  { %s59_s17 = sshll.u32 %s1342_s16, 4  ;;  %p1286_p10 = scmp.ne.s32.totalorder %s1492_s5, %s1285_s21  ;;  %s60_s17 = int_to_ptr.vmem [resolvable:$true] %s59_s17 }
  0x36   :  { %p1289_p11 = scmp.lt.u32.totalorder %s1285_s21, %s1492_s5 }
  0x38   :  { %p1291_p12 = pnand %p1289_p11, %p1286_p10 }
  0x3a   :  { %1294 = shalt.err (!%p1291_p12)
}
  0x3b   :  { %s1295_s1 = scalar_lea.vmem %s60_s17, 1024  ;;  %p1300_p0 = scmp.lt.s32.totalorder %s60_s17, %s60_s17 }
  0x3c   :  { %p1296_p13 = scmp.ne.s32.totalorder %s60_s17, %s1295_s1  ;;  %p1301_p1 = scmp.lt.s32.totalorder %s1295_s1, %s1295_s1 }
  0x3e   :  { %p1302_p2 = por %p1301_p1, %p1300_p0 }
  0x40   :  { %p1303_p3 = pnand %p1302_p2, %p1296_p13 }
  0x42   :  { %1306 = shalt.err (!%p1303_p3)
}
  0x43   :  { %65 = dma.hbm_to_vmem [thread:$0]  %s1492_s5, 1024, %s60_s17, [#allocation9], %s1338_s11, %s1338_s11, %s1339_s12  }
  0x44   :  { %1329 = dma.done.wait [#allocation3], 448  }
  0x45   :  { %1330 = vsyncadd [#allocation3], 4294966848 }
  0x46   :  { %1331 = dma.done.wait [#allocation6], 7296  }
  0x47   :  { %1332 = vsyncadd [#allocation6], 4294960000 }
  0x48   :  { %1333 = dma.done.wait [#allocation9], 1024  }
  0x49   :  { %1334 = vsyncadd [#allocation9], 4294966272  ;;  %v1143_v0 = vld [vmem:[#allocation5 + $0x40] sm:$0xff]   ;;  %v1147_v4 = vld [vmem:[#allocation5 + $0x48] sm:$0xff]   ;;  %v1343_v43 = vmov 0.0   ;;  %vm1344_vm0 = vmmov 0  }
  0x4a   :  { %v1144_v1 = vld [vmem:[#allocation5] sm:$0xff]   ;;  %1002 = vmatprep.subr.bf16.mxu0 %v1143_v0  ;;  %v1148_v5 = vld [vmem:[#allocation5 + $0x8] sm:$0xff]   ;;  %v1151_v8 = vld [vmem:[#allocation5 + $0x50] sm:$0xff]   ;;  %vm508_vm1 = vcmask 130048  }
  0x4b   :  { %v1145_v2 = vld [vmem:[#allocation5 + $0xc0] sm:$0xff]   ;;  %1003 = vmatpush3.bf16.msra.mxu0 %v1144_v1  ;;  %v1149_v6 = vld [vmem:[#allocation5 + $0xc8] sm:$0xff]   ;;  %v1152_v9 = vld [vmem:[#allocation5 + $0x10] sm:$0xff]  }
  0x4c   :  { %v1146_v3 = vld [vmem:[#allocation5 + $0x80] sm:$0xff]   ;;  %1024 = vmatprep.subr.bf16.mxu1 %v1145_v2  ;;  %1004 = vmatprep.subr.bf16.mxu0 %v1147_v4  ;;  %v1150_v7 = vld [vmem:[#allocation5 + $0x88] sm:$0xff]   ;;  %v1153_v10 = vld [vmem:[#allocation5 + $0xd0] sm:$0xff]  }
  0x4d   :  { %1025 = vmatpush3.bf16.msra.mxu1 %v1146_v3  ;;  %v1154_v11 = vld [vmem:[#allocation5 + $0x90] sm:$0xff]   ;;  %v1155_v12 = vld [vmem:[#allocation5 + $0x58] sm:$0xff]   ;;  %v1159_v16 = vld [vmem:[#allocation5 + $0x60] sm:$0xff]  }
  0x4e   :  { %1026 = vmatprep.subr.bf16.mxu1 %v1149_v6  ;;  %v1156_v13 = vld [vmem:[#allocation5 + $0x18] sm:$0xff]   ;;  %v1160_v17 = vld [vmem:[#allocation5 + $0x20] sm:$0xff]   ;;  %v1163_v20 = vld [vmem:[#allocation5 + $0x68] sm:$0xff]  }
  0x4f   :  { %1005 = vmatpush3.bf16.msra.mxu0 %v1148_v5  ;;  %v1157_v14 = vld [vmem:[#allocation5 + $0xd8] sm:$0xff]   ;;  %v1161_v18 = vld [vmem:[#allocation5 + $0xe0] sm:$0xff]   ;;  %v1164_v21 = vld [vmem:[#allocation5 + $0x28] sm:$0xff]  }
  0x50   :  { %1006 = vmatprep.subr.bf16.mxu0 %v1151_v8  ;;  %v1158_v15 = vld [vmem:[#allocation5 + $0x98] sm:$0xff]   ;;  %v1162_v19 = vld [vmem:[#allocation5 + $0xa0] sm:$0xff]   ;;  %v1165_v22 = vld [vmem:[#allocation5 + $0xe8] sm:$0xff]  }
  0x51   :  { %1027 = vmatpush3.bf16.msra.mxu1 %v1150_v7  ;;  %v1166_v23 = vld [vmem:[#allocation5 + $0xa8] sm:$0xff]   ;;  %v1167_v24 = vld [vmem:[#allocation5 + $0x70] sm:$0xff]   ;;  %v1171_v28 = vld [vmem:[#allocation5 + $0x78] sm:$0xff]  }
  0x52   :  { %1028 = vmatprep.subr.bf16.mxu1 %v1153_v10  ;;  %v1168_v25 = vld [vmem:[#allocation5 + $0x30] sm:$0xff]   ;;  %v1172_v29 = vld [vmem:[#allocation5 + $0x38] sm:$0xff]   ;;  %v81_v31 = vld [vmem:[#allocation2] sm:$0xff] }
  0x53   :  { %1007 = vmatpush3.bf16.msra.mxu0 %v1152_v9  ;;  %v1169_v26 = vld [vmem:[#allocation5 + $0xf0] sm:$0xff]   ;;  %v1173_v30 = vld [vmem:[#allocation5 + $0xf8] sm:$0xff]   ;;  %v927_v32 = vcombine.low %v81_v31, %v81_v31  ;;  %v928_v33 = vcombine.high %v81_v31, %v81_v31  ;;  %v1177_v35 = vld [vmem:[#allocation5 + $0x140] sm:$0xff]  }
  0x54   :  { %1008 = vmatprep.subr.bf16.mxu0 %v1155_v12  ;;  %v1170_v27 = vld [vmem:[#allocation5 + $0xb0] sm:$0xff]   ;;  %v1176_v34 = vld [vmem:[#allocation5 + $0xb8] sm:$0xff]   ;;  %v1180_v39 = vld [vmem:[#allocation5 + $0x100] sm:$0xff]  }
  0x55   :  { %1029 = vmatpush3.bf16.msra.mxu1 %v1154_v11  ;;  %v82_v36 = vld [vmem:[#allocation2 + $0x8] sm:$0xff]  ;;  %544 = vmatprep.mubr.bf16.mxu0 %v928_v33  ;;  %v1185_v45 = vld [vmem:[#allocation5 + $0x158] sm:$0xff]   ;;  %v1187_v47 = vld [vmem:[#allocation5 + $0x160] sm:$0xff]  }
  0x56   :  { %1030 = vmatprep.subr.bf16.mxu1 %v1157_v14  ;;  %v929_v37 = vcombine.low %v82_v36, %v82_v36  ;;  %v930_v38 = vcombine.high %v82_v36, %v82_v36  ;;  %v1181_v40 = vld [vmem:[#allocation5 + $0x148] sm:$0xff]   ;;  %v1183_v42 = vld [vmem:[#allocation5 + $0x150] sm:$0xff]   ;;  %v1186_v46 = vld [vmem:[#allocation5 + $0x118] sm:$0xff]  }
  0x57   :  { %1009 = vmatpush3.bf16.msra.mxu0 %v1156_v13  ;;  %v1182_v41 = vld [vmem:[#allocation5 + $0x108] sm:$0xff]   ;;  %v1184_v44 = vld [vmem:[#allocation5 + $0x110] sm:$0xff]   ;;  %v1188_v48 = vld [vmem:[#allocation5 + $0x120] sm:$0xff]  }
  0x58   :  { %1010 = vmatprep.subr.bf16.mxu0 %v1159_v16  ;;  %584 = vmatprep.mubr.bf16.mxu1 %v930_v38  ;;  %v1189_v49 = vld [vmem:[#allocation5 + $0x168] sm:$0xff]   ;;  %v1195_v50 = vld [vmem:[#allocation5 + $0x180] sm:$0xff]   ;;  %v83_v51 = vld [vmem:[#allocation2 + $0x10] sm:$0xff] }
  0x59   :  { %1031 = vmatpush3.bf16.msra.mxu1 %v1158_v15  ;;  %v1190_v52 = vld [vmem:[#allocation5 + $0x128] sm:$0xff]   ;;  %v932_v53 = vcombine.high %v83_v51, %v83_v51  ;;  %v1198_v54 = vld [vmem:[#allocation2 + $0x18] ss:$0 sps:$4 sm:$0xff]   ;;  %v1191_v55 = vld [vmem:[#allocation5 + $0x170] sm:$0xff]   ;;  %v931_v59 = vcombine.low %v83_v51, %v83_v51 }
  0x5a   :  { %1032 = vmatprep.subr.bf16.mxu1 %v1161_v18  ;;  %v1192_v56 = vld [vmem:[#allocation5 + $0x130] sm:$0xff]   ;;  %v1193_v57 = vld [vmem:[#allocation5 + $0x178] sm:$0xff]   ;;  %v1199_v60 = vld [vmem:[#allocation7] sm:$0xff]  }
  0x5b   :  { %1011 = vmatpush3.bf16.msra.mxu0 %v1160_v17  ;;  %v1194_v58 = vld [vmem:[#allocation5 + $0x138] sm:$0xff]   ;;  %v1200_v61 = vld [vmem:[#allocation7 + $0x8] sm:$0xff]   ;;  %v1202_v63 = vld [vmem:[#allocation7 + $0x18] sm:$0xff]  }
  0x5c   :  { %1012 = vmatprep.subr.bf16.mxu0 %v1163_v20  ;;  %v1201_v62 = vld [vmem:[#allocation7 + $0x10] sm:$0xff]   ;;  %v1203_v0 = vld [vmem:[#allocation7 + $0x20] sm:$0xff]   ;;  %v1204_v1 = vld [vmem:[#allocation7 + $0x28] sm:$0xff]  }
  0x5d   :  { %1033 = vmatpush3.bf16.msra.mxu1 %v1162_v19  ;;  %v1205_v2 = vld [vmem:[#allocation7 + $0x30] sm:$0xff]   ;;  %v1206_v3 = vld [vmem:[#allocation7 + $0x38] sm:$0xff]   ;;  %v1207_v4 = vld [vmem:[#allocation8] sm:$0xff]  }
  0x5e   :  { %1034 = vmatprep.subr.bf16.mxu1 %v1165_v22  ;;  %v1208_v5 = vld [vmem:[#allocation8 + $0x8] sm:$0xff]   ;;  %v1209_v6 = vld [vmem:[#allocation8 + $0x10] sm:$0xff]   ;;  %v1210_v7 = vld [vmem:[#allocation8 + $0x18] sm:$0xff]  }
  0x5f   :  { %1013 = vmatpush3.bf16.msra.mxu0 %v1164_v21  ;;  %v1211_v8 = vld [vmem:[#allocation8 + $0x20] sm:$0xff]   ;;  %v1212_v9 = vld [vmem:[#allocation8 + $0x28] sm:$0xff]   ;;  %v926_v11 = vld [vmem:[%s1489_s2] ss:$0 sm:$0xff] }
  0x60   :  { %1014 = vmatprep.subr.bf16.mxu0 %v1167_v24  ;;  %v1213_v36 = vld [vmem:[#allocation8 + $0x30] sm:$0xff]   ;;  %v984_v38 = vld [vmem:[%s1491_s4] ss:$0 sm:$0xff]  ;;  %s1345_s4 = smov [#allocation10]  }
  0x61   :  { %1035 = vmatpush3.bf16.msra.mxu1 %v1166_v23  ;;  %s915_s28 = sshll.u32 %s1345_s4, 4  ;;  %s916_s28 = int_to_ptr.vmem [resolvable:$true] %s915_s28 }
  0x62   :  { %1036 = vmatprep.subr.bf16.mxu1 %v1169_v26  ;;  %p1312_p5 = scmp.lt.s32.totalorder %s916_s28, %s916_s28 }
  0x63   :  { %1015 = vmatpush3.bf16.msra.mxu0 %v1168_v25 }
  0x64   :  { %1016 = vmatprep.subr.bf16.mxu0 %v1171_v28 }
  0x65   :  { %1037 = vmatpush3.bf16.msra.mxu1 %v1170_v27 }
  0x66   :  { %1038 = vmatprep.subr.bf16.mxu1 %v1173_v30 }
  0x67   :  { %1017 = vmatpush3.bf16.msra.mxu0 %v1172_v29 }
  0x68   :  { %1046 = vmatprep.subr.bf16.mxu0 %v1177_v35 }
  0x69   :  { %1039 = vmatpush3.bf16.msra.mxu1 %v1176_v34 }
  0x6a   :  { %545 = vmatmul.mubr.bf16.vlgmr.msra.gmra.mrb[0].mxu0 %v927_v32  ;;  %1088 = vmatprep.subr.bf16.mxu1 %v1343_v43 }
  0x6b   :  { %1047 = vmatpush3.bf16.msra.mxu0 %v1180_v39  ;;  %624 = vmatprep.mubr.bf16.mxu0 %v932_v53 }
  0x6c   :  { %585 = vmatmul.mubr.bf16.vlgmr.msra.gmra.mrb[0].mxu1 %v929_v37  ;;  %1048 = vmatprep.subr.bf16.mxu0 %v1181_v40  ;;  %v1214_v37 = vld [vmem:[#allocation8 + $0x38] sm:$0xff]  }
  0x6d   :  { %1090 = vmatprep.mubr.msk.bf16.mxu1 %vm1344_vm0, %v1343_v43  ;;  %1089 = vmatpush3.bf16.msra.mxu1 %v1195_v50 }
  0x6e   :  { %1094 = vmatprep.subr.bf16.mxu1 %v1343_v43 }
  0x6f   :  { %1049 = vmatpush3.bf16.msra.mxu0 %v1182_v41 }
  0x70   :  { %1050 = vmatprep.subr.bf16.mxu0 %v1183_v42 }
  0x73   :  { %1051 = vmatpush3.bf16.msra.mxu0 %v1184_v44 }
  0x74   :  { %1052 = vmatprep.subr.bf16.mxu0 %v1185_v45  ;;  %1091 = vmatmul.mubr.msk.bf16.vlgmr.msra.gmra.mrb[4].mxu1 %vm508_vm1, %v1198_v54 }
  0x75   :  { %1110 = vmatprep.mubr.msk.bf16.mxu1 %vm1344_vm0, %v1343_v43  ;;  %1095 = vmatpush3.bf16.msra.mxu1 %v1199_v60 }
  0x76   :  { %1096 = vmatprep.subr.bf16.mxu1 %v1343_v43 }
  0x77   :  { %1053 = vmatpush3.bf16.msra.mxu0 %v1186_v46 }
  0x78   :  { %1054 = vmatprep.subr.bf16.mxu0 %v1187_v47  ;;  %v993_v47 = vld [vmem:[%s1493_s6] ss:$0 sm:$0xff]  ;;  %s1307_s6 = scalar_lea.vmem %s916_s28, 128 }
  0x79   :  { %1097 = vmatpush3.bf16.msra.mxu1 %v1200_v61  ;;  %p1308_p4 = scmp.ne.s32.totalorder %s916_s28, %s1307_s6  ;;  %p1313_p6 = scmp.lt.s32.totalorder %s1307_s6, %s1307_s6 }
  0x7a   :  { %1098 = vmatprep.subr.bf16.mxu1 %v1343_v43 }
  0x7b   :  { %1055 = vmatpush3.bf16.msra.mxu0 %v1188_v48  ;;  %p1314_p7 = por %p1313_p6, %p1312_p5 }
  0x7c   :  { %1056 = vmatprep.subr.bf16.mxu0 %v1189_v49 }
  0x7d   :  { %1099 = vmatpush3.bf16.msra.mxu1 %v1201_v62  ;;  %p1315_p8 = pnand %p1314_p7, %p1308_p4 }
  0x7e   :  { %1100 = vmatprep.subr.bf16.mxu1 %v1343_v43 }
  0x7f   :  { %1057 = vmatpush3.bf16.msra.mxu0 %v1190_v52 }
  0x80   :  { %1058 = vmatprep.subr.bf16.mxu0 %v1191_v55 }
  0x81   :  { %1101 = vmatpush3.bf16.msra.mxu1 %v1202_v63 }
  0x82   :  { %1102 = vmatprep.subr.bf16.mxu1 %v1343_v43 }
  0x83   :  { %1059 = vmatpush3.bf16.msra.mxu0 %v1192_v56 }
  0x84   :  { %1060 = vmatprep.subr.bf16.mxu0 %v1193_v57 }
  0x85   :  { %1103 = vmatpush3.bf16.msra.mxu1 %v1203_v0 }
  0x86   :  { %1104 = vmatprep.subr.bf16.mxu1 %v1343_v43 }
  0x87   :  { %1061 = vmatpush3.bf16.msra.mxu0 %v1194_v58 }
  0x88   :  { %1114 = vmatprep.subr.bf16.mxu0 %v1343_v43 }
  0x89   :  { %1105 = vmatpush3.bf16.msra.mxu1 %v1204_v1 }
  0x8a   :  { %625 = vmatmul.mubr.bf16.vlgmr.msra.gmra.mrb[4].mxu0 %v931_v59  ;;  %1106 = vmatprep.subr.bf16.mxu1 %v1343_v43 }
  0x8b   :  { %1130 = vmatprep.mubr.msk.bf16.mxu0 %vm1344_vm0, %v1343_v43  ;;  %1115 = vmatpush3.bf16.msra.mxu0 %v1207_v4 }
  0x8c   :  { %1116 = vmatprep.subr.bf16.mxu0 %v1343_v43 }
  0x8d   :  { %1107 = vmatpush3.bf16.msra.mxu1 %v1205_v2 }
  0x8e   :  { %1108 = vmatprep.subr.bf16.mxu1 %v1343_v43 }
  0x8f   :  { %1117 = vmatpush3.bf16.msra.mxu0 %v1208_v5 }
  0x90   :  { %1118 = vmatprep.subr.bf16.mxu0 %v1343_v43 }
  0x91   :  { %1109 = vmatpush3.bf16.msra.mxu1 %v1206_v3 }
  0x93   :  { %1119 = vmatpush3.bf16.msra.mxu0 %v1209_v6 }
  0x94   :  { %1120 = vmatprep.subr.bf16.mxu0 %v1343_v43 }
  0x97   :  { %1121 = vmatpush3.bf16.msra.mxu0 %v1210_v7 }
  0x98   :  { %1122 = vmatprep.subr.bf16.mxu0 %v1343_v43 }
  0x9b   :  { %1123 = vmatpush3.bf16.msra.mxu0 %v1211_v8 }
  0x9c   :  { %1124 = vmatprep.subr.bf16.mxu0 %v1343_v43 }
  0x9f   :  { %1125 = vmatpush3.bf16.msra.mxu0 %v1212_v9 }
  0xa0   :  { %1126 = vmatprep.subr.bf16.mxu0 %v1343_v43 }
  0xa3   :  { %1127 = vmatpush3.bf16.msra.mxu0 %v1213_v36 }
  0xa4   :  { %1128 = vmatprep.subr.bf16.mxu0 %v1343_v43 }
  0xa7   :  { %1129 = vmatpush3.bf16.msra.mxu0 %v1214_v37 }
 0x13d   :  { %v1018_v10 = vpop.f32.mrb[0].mxu0 }
 0x13e   :  { %v1019_v12 = vpop.f32.mrb[1].mxu0 }
 0x13f   :  { %v1020_v13 = vadd.f32 %v1019_v12, %v1018_v10  ;;  %v1021_v14 = vpop.f32.mrb[2].mxu0  ;;  %v1040_v15 = vpop.f32.mrb[0].mxu1 }
 0x140   :  { %v1022_v16 = vpop.f32.mrb[3].mxu0  ;;  %v1041_v17 = vpop.f32.mrb[1].mxu1 }
 0x141   :  { %v547_v18 = vadd.f32 %v1020_v13, %v926_v11  ;;  %v1042_v19 = vadd.f32 %v1041_v17, %v1040_v15  ;;  %v1043_v20 = vpop.f32.mrb[2].mxu1 }
 0x142   :  { %v1044_v21 = vpop.f32.mrb[3].mxu1 }
 0x143   :  { %v587_v22 = vadd.f32 %v1042_v19, %v547_v18 }
 0x147   :  { %v666_v23 = vpop.f32.mrb[4].mxu1 }
 0x148   :  { %v1092_v24 = vpop.f32.mrb[5].mxu1 }
 0x149   :  { %v669_v25 = vpop.f32.mrb[6].mxu1 }
 0x14a   :  { %v1093_v26 = vpop.f32.mrb[7].mxu1 }
 0x15d   :  { %v1062_v27 = vpop.f32.mrb[4].mxu0 }
 0x15e   :  { %v1063_v28 = vpop.f32.mrb[5].mxu0 }
 0x15f   :  { %v1064_v29 = vadd.f32 %v1063_v28, %v1062_v27  ;;  %v1065_v30 = vpop.f32.mrb[6].mxu0 }
 0x160   :  { %v1066_v31 = vpop.f32.mrb[7].mxu0 }
 0x161   :  { %v627_v32 = vadd.f32 %v1064_v29, %v587_v22 }
 0x163   :  { %v667_v33 = vadd.f32 %v666_v23, %v627_v32 }
 0x165   :  { %v672_v34 = vmax.f32 %v667_v33, 0.0 }
 0x167   :  { %v673_v35 = vpack.c.bf16 %v672_v34, %v672_v34 }
 0x169   :  { %1111 = vmatmul.mubr.bf16.vlgmr.msra.gmra.mrb[8].mxu1 %v673_v35 }
 0x23c   :  { %v779_v39 = vpop.f32.mrb[8].mxu1 }
 0x23d   :  { %v780_v40 = vadd.f32 %v984_v38, %v779_v39  ;;  %v1112_v41 = vpop.f32.mrb[9].mxu1 }
 0x23e   :  { %v782_v42 = vpop.f32.mrb[10].mxu1 }
 0x23f   :  { %v785_v44 = vmax.f32 %v780_v40, 0.0  ;;  %v1113_v45 = vpop.f32.mrb[11].mxu1 }
 0x241   :  { %v786_v46 = vpack.c.bf16 %v785_v44, %v785_v44 }
 0x243   :  { %1131 = vmatmul.mubr.bf16.vlgmr.msra.gmra.mrb[8].mxu0 %v786_v46 }
 0x316   :  { %v892_v48 = vpop.f32.mrb[8].mxu0 }
 0x317   :  { %v893_v43 = vadd.f32 %v993_v47, %v892_v48  ;;  %v1132_v49 = vpop.f32.mrb[9].mxu0 }
 0x318   :  { %v895_v50 = vpop.f32.mrb[10].mxu0 }
 0x319   :  { %898 = vmax.xlane.f32.xlu0 %v893_v43  ;;  %v1133_v51 = vpop.f32.mrb[11].mxu0 }
 0x3a6   :  { %v899_v52 = vpop.xlane.xlu0 %898 }
 0x3a7   :  { %v900_v53 = vsub.f32 %v893_v43, %v899_v52 }
 0x3a9   :  { %v901_v54 = vmul.f32 1.442695, %v900_v53 }
 0x3ab   :  { %1215 = vpow2.f32 %v901_v54 }
 0x3b5   :  { %v1216_v55 = vpop.eup %1215 }
 0x3b6   :  { %903 = vadd.xlane.f32.xlu0 %v1216_v55 }
 0x443   :  { %v904_v56 = vpop.xlane.xlu0 %903 }
 0x444   :  { %1217 = vlog2.f32 %v904_v56 }
 0x44e   :  { %v1218_v57 = vpop.eup %1217 }
 0x44f   :  { %v906_v58 = vmul.f32 0.6931472, %v1218_v57 }
 0x451   :  { %v907_v59 = vsub.f32 %v900_v53, %v906_v58 }
 0x453   :  { %908 = vst [vmem:[#allocation10] sm:$0xff] %v907_v59 }
 0x454   :  { %1318 = shalt.err (!%p1315_p8)
}
 0x455   :  { %s1319_s8 = scalar_lea.hbm %s1494_s7, 128 }
 0x456   :  { %p1320_p9 = scmp.ne.s32.totalorder %s1494_s7, %s1319_s8  ;;  %p1323_p10 = scmp.lt.u32.totalorder %s1319_s8, %s1494_s7 }
 0x458   :  { %p1325_p11 = pnand %p1323_p10, %p1320_p9 }
 0x45a   :  { %1328 = shalt.err (!%p1325_p11)
}
 0x45b   :  { %918 = dma.vmem_to_hbm [thread:$0]  %s916_s28, 128, %s1494_s7, [#allocation4]  }
 0x45c   :  { %1335 = dma.done.wait [#allocation4], 128  }
 0x45d   :  { %1336 = vsyncadd [#allocation4], 4294967168 }
 0x45e   :  { %922 = vsyncpa [#allocation3], 1 }
 0x45f   :  { %923 = vsyncpa [#allocation6], 1 }
 0x460   :  { %924 = vsyncpa [#allocation9], 1 }
 0x461   :  { %925 = vsyncpa [#allocation4], 1 }

</bundles_post_ra>
